<compile_context>
chip_gen: v5e
topology: v5e:2x2
jax: 0.10.0
libtpu: 0.0.40
codegen_flags: <defaults>
</compile_context>

<pallas_src>
import jax
import jax.numpy as jnp
from jax.experimental import pallas as pl
from jax.experimental.pallas import tpu as pltpu


# ----------------------------------------------------------------------------
# helpers
# ----------------------------------------------------------------------------
def _ceil_to(x, m):
    return ((x + m - 1) // m) * m


def _pick_tile(size, unit, cap):
    """Largest multiple of `unit` that divides `size` (itself a multiple of
    `unit`) and is <= min(size, cap)."""
    best = unit
    t = unit
    hi = min(size, max(cap, unit))
    while t <= hi:
        if size % t == 0:
            best = t
        t += unit
    return best


# ----------------------------------------------------------------------------
# Pallas kernel: per-row fused multiply-add   out = x * scale + bias
#   x_ref : (tm, tl)   s_ref / b_ref : (tm, 1)   (broadcast across lanes)
# ----------------------------------------------------------------------------
def _normalize_kernel(x_ref, s_ref, b_ref, o_ref):
    o_ref[...] = x_ref[...] * s_ref[...] + b_ref[...]


# ----------------------------------------------------------------------------
# wrapper
# ----------------------------------------------------------------------------
def batch_normalize(x, mean, std, *, max_lanes=2048, max_rows=1024,
                    block_byte_budget=2 * 1024 * 1024):
    """(x - mean) / std with per-channel mean/std, x in NCHW layout.

    x    : (N, C, H, W) float array
    mean : (C,) float array
    std  : (C,) float array
    """
    n, c, h, w = x.shape
    dtype = x.dtype
    itemsize = jnp.dtype(dtype).itemsize

    # Fold (x - mean) / std  ->  x * (1/std) + (-mean/std)   (one FMA / elem)
    std_f32 = std.astype(jnp.float32)
    mean_f32 = mean.astype(jnp.float32)
    scale = (1.0 / std_f32).astype(dtype)                     # (C,)
    bias = (-mean_f32 / std_f32).astype(dtype)                # (C,)

    # Per-row (row = one (batch, channel) slice) scale / bias columns.
    # Tiny: N*C elements, built once outside the kernel.
    scale_rows = jnp.broadcast_to(scale[None, :], (n, c)).reshape(n * c, 1)
    bias_rows = jnp.broadcast_to(bias[None, :], (n, c)).reshape(n * c, 1)

    # Copy-free 2-D view: rows = (batch, channel) pairs, lanes = spatial.
    m, l = n * c, h * w
    x2 = x.reshape(m, l)

    # --- tile selection (last-dim multiple of 128, second-to-last of 8) ----
    lp = _ceil_to(l, 128)
    mp = _ceil_to(m, 8)
    tl = _pick_tile(lp, 128, max_lanes)
    # Keep one x block <= block_byte_budget so double-buffered in+out blocks
    # stay well inside the default scoped-VMEM limit on all generations.
    rows_by_budget = max(8, (block_byte_budget // (tl * itemsize)) // 8 * 8)
    tm = _pick_tile(mp, 8, min(max_rows, rows_by_budget))

    # Only minimal alignment padding is ever materialized.
    padded = (mp, lp) != (m, l)
    if padded:
        x2 = jnp.pad(x2, ((0, mp - m), (0, lp - l)))
        scale_rows = jnp.pad(scale_rows, ((0, mp - m), (0, 0)))
        bias_rows = jnp.pad(bias_rows, ((0, mp - m), (0, 0)))

    out = pl.pallas_call(
        _normalize_kernel,
        out_shape=jax.ShapeDtypeStruct((mp, lp), dtype),
        grid=(mp // tm, lp // tl),
        in_specs=[
            pl.BlockSpec((tm, tl), lambda i, j: (i, j)),
            pl.BlockSpec((tm, 1), lambda i, j: (i, 0)),
            pl.BlockSpec((tm, 1), lambda i, j: (i, 0)),
        ],
        out_specs=pl.BlockSpec((tm, tl), lambda i, j: (i, j)),
        compiler_params=pltpu.CompilerParams(
            dimension_semantics=("parallel", "parallel")),
    )(x2, scale_rows, bias_rows)

    if padded:
        out = out[:m, :l]
    return out.reshape(n, c, h, w)


# ----------------------------------------------------------------------------
# main
# ----------------------------------------------------------------------------
if __name__ == "__main__":
    key = jax.random.PRNGKey(0)

    B, C, H, W = 2, 4, 16, 16
    x = jax.random.uniform(key, (B, C, H, W), jnp.float32, 0.0, 1.0)
    mean = jnp.array([0.493, 0.468, 0.438, 0.213], jnp.float32)
    std = jnp.array([0.544, 0.521, 0.499, 0.285], jnp.float32)

    fwd = jax.jit(batch_normalize)
    out = fwd(x, mean, std)
    out = jax.block_until_ready(out)

    # reference (exactly the PyTorch module's forward, in JAX)
    ref = (x - mean[None, :, None, None]) / std[None, :, None, None]

    assert out.shape == x.shape and out.dtype == x.dtype
    assert bool(jnp.allclose(out, ref, atol=1e-5, rtol=1e-5))
    print("KERNEL_OK")
</pallas_src>

<mosaic_0001>
module attributes {stable_mosaic.version = 11 : i64} {
  func.func @_normalize_kernel(%arg0: i32, %arg1: i32, %arg2: memref<8x256xf32, #tpu.memory_space<vmem>>, %arg3: memref<8x1xf32, #tpu.memory_space<vmem>>, %arg4: memref<8x1xf32, #tpu.memory_space<vmem>>, %arg5: memref<8x256xf32, #tpu.memory_space<vmem>>) attributes {dimension_semantics = [#tpu.dimension_semantics<parallel>, #tpu.dimension_semantics<parallel>], iteration_bounds = array<i64: 1, 1>, scalar_prefetch = 0 : i64, scratch_operands = 0 : i64, tpu.core_type = #tpu.core_type<tc>, window_params = [{transform_indices = @transform_0, window_bounds = array<i64: 8, 256>}, {transform_indices = @transform_1, window_bounds = array<i64: 8, 1>}, {transform_indices = @transform_2, window_bounds = array<i64: 8, 1>}, {transform_indices = @transform_3, window_bounds = array<i64: 8, 256>}]} {
    %c0 = arith.constant 0 : index
    %c0_0 = arith.constant 0 : index
    %0 = vector.load %arg2[%c0, %c0_0] : memref<8x256xf32, #tpu.memory_space<vmem>>, vector<8x256xf32>
    %c0_1 = arith.constant 0 : index
    %c0_2 = arith.constant 0 : index
    %1 = vector.load %arg3[%c0_1, %c0_2] : memref<8x1xf32, #tpu.memory_space<vmem>>, vector<8x1xf32>
    %2 = vector.broadcast %1 : vector<8x1xf32> to vector<8x256xf32>
    %3 = arith.mulf %0, %2 : vector<8x256xf32>
    %c0_3 = arith.constant 0 : index
    %c0_4 = arith.constant 0 : index
    %4 = vector.load %arg4[%c0_3, %c0_4] : memref<8x1xf32, #tpu.memory_space<vmem>>, vector<8x1xf32>
    %5 = vector.broadcast %4 : vector<8x1xf32> to vector<8x256xf32>
    %6 = arith.addf %3, %5 : vector<8x256xf32>
    %c0_5 = arith.constant 0 : index
    %c0_6 = arith.constant 0 : index
    %7 = vector.load %arg5[%c0_5, %c0_6] : memref<8x256xf32, #tpu.memory_space<vmem>>, vector<8x256xf32>
    tpu.vector_store %arg5[%c0_5, %c0_6], %6 {strides = array<i32>} : memref<8x256xf32, #tpu.memory_space<vmem>>, vector<8x256xf32>,
    return
  }
  func.func @transform_0(%arg0: i32, %arg1: i32) -> (i32, i32) {
    %c0_i32 = arith.constant 0 : i32
    return %arg0, %arg1 : i32, i32
  }
  func.func @transform_1(%arg0: i32, %arg1: i32) -> (i32, i32) {
    %c0_i32 = arith.constant 0 : i32
    %c0_i32_0 = arith.constant 0 : i32
    return %arg0, %c0_i32 : i32, i32
  }
  func.func @transform_2(%arg0: i32, %arg1: i32) -> (i32, i32) {
    %c0_i32 = arith.constant 0 : i32
    %c0_i32_0 = arith.constant 0 : i32
    return %arg0, %c0_i32 : i32, i32
  }
  func.func @transform_3(%arg0: i32, %arg1: i32) -> (i32, i32) {
    %c0_i32 = arith.constant 0 : i32
    return %arg0, %arg1 : i32, i32
  }
}

</mosaic_0001>

<bundles_post_ra>
// kernel: batch_normalize.1
= control target key start
LH: loop header
LB: loop body
LE: loop exit
PB: predicated region body
PF: predicated region fallthrough
CT: control target
= control target key end

     0   :  { %v40_v0 = vmov 0   ;;  %s79_s1 = inlined_call_operand.vmem [shape: f32[8,1], index: 1, kind: input, shape index: {}]   ;;  %s80_s2 = inlined_call_operand.vmem [shape: f32[8,1], index: 2, kind: input, shape index: {}]   ;;  %s81_s0 = inlined_call_operand.vmem [shape: f32[8,256], index: 0, kind: input, shape index: {}]   ;;  %s82_s3 = inlined_call_operand.vmem [shape: f32[8,256], index: 3, kind: output, shape index: {}]  }
   0x1   :  { %39 = vset.pattern.permute.xlu0 %v40_v0  ;;  %v16_v1 = vld [vmem:[%s79_s1] sm:$0xff]  ;;  %v15_v5 = vld [vmem:[%s81_s0 + $0x8] sm:$0xff] }
   0x2   :  { %19 = vperm.xlu0 %39, %v16_v1   ;;  %v24_v2 = vld [vmem:[%s80_s2] sm:$0xff] }
   0x3   :  { %v14_v4 = vld [vmem:[%s81_s0] sm:$0xff] }
   0xa   :  { %27 = vperm.xlu0 %39, %v24_v2  }
  0x74   :  { %v20_v3 = vpop.permute.xlu0 %19 }
  0x75   :  { %v22_v6 = vmul.f32 %v20_v3, %v14_v4  ;;  %v23_v7 = vmul.f32 %v20_v3, %v15_v5 }
  0x7c   :  { %v28_v8 = vpop.permute.xlu0 %27 }
  0x7d   :  { %v30_v9 = vadd.f32 %v28_v8, %v22_v6  ;;  %v31_v10 = vadd.f32 %v28_v8, %v23_v7 }
  0x7f   :  { %32 = vst [vmem:[%s82_s3] sm:$0xff] %v30_v9 }
  0x80   :  { %33 = vst [vmem:[%s82_s3 + $0x8] sm:$0xff] %v31_v10 }

</bundles_post_ra>
